<compile_context>
chip_gen: v6e
topology: v6e:2x2x1
jax: 0.10.0
libtpu: 0.0.40
codegen_flags: <defaults>
</compile_context>

<pallas_src>
import functools

import jax
import jax.numpy as jnp
from jax.experimental import pallas as pl
from jax.experimental.pallas import tpu as pltpu


def _factor_decoder_kernel(e_ref, w_eb_ref, w_heads_ref, b_all_ref, z_cat_ref,
                           out_ref, *, hidden_dim, z_dim, k):
    hz = hidden_dim + z_dim
    e = e_ref[...]                                            # (TN, E)
    b_all = b_all_ref[...]                                    # (1, H+Z+2)

    # Fused AlphaLayer.proj + FactorDecoder.beta_layer: one e @ W push.
    hb = jnp.dot(e, w_eb_ref[...],
                 preferred_element_type=jnp.float32) + b_all[:, :hz]   # (TN, H+Z)
    h = hb[:, :hidden_dim]
    h = jnp.where(h >= 0.0, h, 0.01 * h)                      # LeakyReLU (slope 0.01)
    beta = hb[:, hidden_dim:hz]                               # (TN, Z)

    # Fused mu_layer + std_layer heads: col 0 = mu_alpha, col 1 = pre-softplus.
    heads = jnp.dot(h, w_heads_ref[...],
                    preferred_element_type=jnp.float32) + b_all[:, hz:hz + 2]  # (TN, 2)
    mu_alpha = heads[:, 0:1]
    s = jnp.abs(heads[:, 1:2])
    std_alpha = s + jnp.log1p(jnp.exp(-s))                    # softplus, s >= 0 (stable)

    # Fused beta @ [mu_z.T | std_z.T]: (TN, 2K)
    bz = jnp.dot(beta, z_cat_ref[...], preferred_element_type=jnp.float32)
    bm = bz[:, :k]
    bs = bz[:, k:]

    mu_y = mu_alpha + bm
    std_y = jnp.sqrt(std_alpha * std_alpha + bs * bs)
    out_ref[...] = jnp.concatenate([mu_y, std_y], axis=1)     # packed (TN, 2K) store


def factor_decoder_forward(z, e, params, *, block_n=None):
    """z: (2, K, z_dim) stacked (mu_z, std_z); e: (N, E). Returns (mu_y, std_y), each (N, K)."""
    n, emb = e.shape
    mu_z, std_z = z[0], z[1]                                  # (K, Z)
    k, z_dim = mu_z.shape
    hidden = params["w_proj"].shape[1]
    hz = hidden + z_dim

    # --- wrapper-side one-time packing into lane-contiguous blobs ---
    w_eb = jnp.concatenate([params["w_proj"], params["w_beta"]], axis=1)    # (E, H+Z)
    w_heads = jnp.concatenate([params["w_mu"], params["w_std"]], axis=1)    # (H, 2)
    b_all = jnp.concatenate([params["b_proj"], params["b_beta"],
                             params["b_mu"], params["b_std"]], axis=1)      # (1, H+Z+2)
    z_cat = jnp.concatenate([jnp.transpose(mu_z), jnp.transpose(std_z)],
                            axis=1)                                         # (Z, 2K)

    if block_n is None:
        # Full array for small N; otherwise tile (multiple of 8 sublanes) so the
        # double-buffered e-tile + activations stay well under v7x's VMEM budget.
        block_n = n if n <= 1024 else 1024
    grid = (pl.cdiv(n, block_n),)

    kernel = functools.partial(_factor_decoder_kernel,
                               hidden_dim=hidden, z_dim=z_dim, k=k)

    out = pl.pallas_call(
        kernel,
        out_shape=jax.ShapeDtypeStruct((n, 2 * k), jnp.float32),
        grid=grid,
        in_specs=[
            pl.BlockSpec((block_n, emb), lambda i: (i, 0)),        # e, tiled over N
            pl.BlockSpec((emb, hz), lambda i: (0, 0)),             # [w_proj | w_beta]
            pl.BlockSpec((hidden, 2), lambda i: (0, 0)),           # [w_mu | w_std]
            pl.BlockSpec((1, hz + 2), lambda i: (0, 0)),           # all biases packed
            pl.BlockSpec((z_dim, 2 * k), lambda i: (0, 0)),        # [mu_z.T | std_z.T]
        ],
        out_specs=pl.BlockSpec((block_n, 2 * k), lambda i: (i, 0)),
        compiler_params=pltpu.CompilerParams(
            dimension_semantics=("parallel",)),                    # shard N-tiles across TCs (v7x)
    )(e, w_eb, w_heads, b_all, z_cat)

    return out[:, :k], out[:, k:]


def init_params(key, embedding_dim, hidden_dim, z_dim):
    ks = jax.random.split(key, 8)
    scale = 0.1
    # Weights stored pre-transposed as (in, out); biases as (1, out).
    return {
        "w_proj": scale * jax.random.normal(ks[0], (embedding_dim, hidden_dim), jnp.float32),
        "b_proj": scale * jax.random.normal(ks[1], (1, hidden_dim), jnp.float32),
        "w_mu":   scale * jax.random.normal(ks[2], (hidden_dim, 1), jnp.float32),
        "b_mu":   scale * jax.random.normal(ks[3], (1, 1), jnp.float32),
        "w_std":  scale * jax.random.normal(ks[4], (hidden_dim, 1), jnp.float32),
        "b_std":  scale * jax.random.normal(ks[5], (1, 1), jnp.float32),
        "w_beta": scale * jax.random.normal(ks[6], (embedding_dim, z_dim), jnp.float32),
        "b_beta": scale * jax.random.normal(ks[7], (1, z_dim), jnp.float32),
    }


def _reference_forward(z, e, p):
    """Pure-JAX reference mirroring the PyTorch module exactly."""
    mu_z, std_z = z[0], z[1]
    h = e @ p["w_proj"] + p["b_proj"]
    h = jnp.where(h >= 0.0, h, 0.01 * h)
    mu_alpha = h @ p["w_mu"] + p["b_mu"]
    std_alpha = jax.nn.softplus(jnp.abs(h @ p["w_std"] + p["b_std"]))
    beta = e @ p["w_beta"] + p["b_beta"]
    mu_y = mu_alpha + beta @ mu_z.T
    std_y = jnp.sqrt(std_alpha ** 2 + (beta @ std_z.T) ** 2)
    return mu_y, std_y


if __name__ == "__main__":
    N, E, H, Z, K = 8, 16, 32, 4, 1

    key = jax.random.PRNGKey(0)
    k_e, k_z, k_p = jax.random.split(key, 3)

    e = jax.random.normal(k_e, (N, E), jnp.float32)
    # z stacks (mu_z, std_z), each of shape (K, z_dim)
    z = jax.random.normal(k_z, (2, K, Z), jnp.float32)
    params = init_params(k_p, E, H, Z)

    mu_y, std_y = factor_decoder_forward(z, e, params)
    jax.block_until_ready((mu_y, std_y))

    mu_ref, std_ref = _reference_forward(z, e, params)
    assert mu_y.shape == (N, K) and std_y.shape == (N, K)
    assert jnp.allclose(mu_y, mu_ref, atol=1e-5, rtol=1e-5)
    assert jnp.allclose(std_y, std_ref, atol=1e-5, rtol=1e-5)

    print("KERNEL_OK")
</pallas_src>

<mosaic_0001>
module attributes {stable_mosaic.version = 11 : i64} {
  func.func @_factor_decoder_kernel(%arg0: i32, %arg1: memref<8x16xf32, #tpu.memory_space<vmem>>, %arg2: memref<16x36xf32, #tpu.memory_space<vmem>>, %arg3: memref<32x2xf32, #tpu.memory_space<vmem>>, %arg4: memref<1x38xf32, #tpu.memory_space<vmem>>, %arg5: memref<4x2xf32, #tpu.memory_space<vmem>>, %arg6: memref<8x2xf32, #tpu.memory_space<vmem>>) attributes {dimension_semantics = [#tpu.dimension_semantics<parallel>], iteration_bounds = array<i64: 1>, scalar_prefetch = 0 : i64, scratch_operands = 0 : i64, tpu.core_type = #tpu.core_type<tc>, window_params = [{transform_indices = @transform_0, window_bounds = array<i64: 8, 16>}, {pipeline_mode = #tpu.pipeline_mode<synchronous>, transform_indices = @transform_1, window_bounds = array<i64: 16, 36>}, {pipeline_mode = #tpu.pipeline_mode<synchronous>, transform_indices = @transform_2, window_bounds = array<i64: 32, 2>}, {pipeline_mode = #tpu.pipeline_mode<synchronous>, transform_indices = @transform_3, window_bounds = array<i64: 1, 38>}, {pipeline_mode = #tpu.pipeline_mode<synchronous>, transform_indices = @transform_4, window_bounds = array<i64: 4, 2>}, {transform_indices = @transform_5, window_bounds = array<i64: 8, 2>}]} {
    %c0 = arith.constant 0 : index
    %c0_0 = arith.constant 0 : index
    %0 = vector.load %arg1[%c0, %c0_0] : memref<8x16xf32, #tpu.memory_space<vmem>>, vector<8x16xf32>
    %c0_1 = arith.constant 0 : index
    %c0_2 = arith.constant 0 : index
    %1 = vector.load %arg4[%c0_1, %c0_2] : memref<1x38xf32, #tpu.memory_space<vmem>>, vector<1x38xf32>
    %c0_3 = arith.constant 0 : index
    %c0_4 = arith.constant 0 : index
    %2 = vector.load %arg2[%c0_3, %c0_4] : memref<16x36xf32, #tpu.memory_space<vmem>>, vector<16x36xf32>
    %cst = arith.constant dense<0.000000e+00> : vector<8x36xf32>
    %3 = tpu.matmul %0, %2, %cst {dimension_numbers = #tpu.dot_dimension_numbers<[1], [0], [0], [1], [0, 0, 1, 1], [], []>} : vector<8x16xf32>, vector<16x36xf32>, vector<8x36xf32> -> vector<8x36xf32>
    %4 = vector.extract_strided_slice %1 {offsets = [0, 0], sizes = [1, 36], strides = [1, 1]} : vector<1x38xf32> to vector<1x36xf32>
    %5 = vector.broadcast %4 : vector<1x36xf32> to vector<8x36xf32>
    %6 = arith.addf %3, %5 : vector<8x36xf32>
    %7 = vector.extract_strided_slice %6 {offsets = [0, 0], sizes = [8, 32], strides = [1, 1]} : vector<8x36xf32> to vector<8x32xf32>
    %cst_5 = arith.constant 0.000000e+00 : f32
    %8 = vector.broadcast %cst_5 : f32 to vector<8x32xf32>
    %9 = arith.cmpf oge, %7, %8 : vector<8x32xf32>
    %cst_6 = arith.constant 0.00999999977 : f32
    %10 = vector.broadcast %cst_6 : f32 to vector<8x32xf32>
    %11 = arith.mulf %10, %7 : vector<8x32xf32>
    %12 = arith.select %9, %7, %11 : vector<8x32xi1>, vector<8x32xf32>
    %13 = vector.extract_strided_slice %6 {offsets = [0, 32], sizes = [8, 4], strides = [1, 1]} : vector<8x36xf32> to vector<8x4xf32>
    %c0_7 = arith.constant 0 : index
    %c0_8 = arith.constant 0 : index
    %14 = vector.load %arg3[%c0_7, %c0_8] : memref<32x2xf32, #tpu.memory_space<vmem>>, vector<32x2xf32>
    %cst_9 = arith.constant dense<0.000000e+00> : vector<8x2xf32>
    %15 = tpu.matmul %12, %14, %cst_9 {dimension_numbers = #tpu.dot_dimension_numbers<[1], [0], [0], [1], [0, 0, 1, 1], [], []>} : vector<8x32xf32>, vector<32x2xf32>, vector<8x2xf32> -> vector<8x2xf32>
    %16 = vector.extract_strided_slice %1 {offsets = [0, 36], sizes = [1, 2], strides = [1, 1]} : vector<1x38xf32> to vector<1x2xf32>
    %17 = vector.broadcast %16 : vector<1x2xf32> to vector<8x2xf32>
    %18 = arith.addf %15, %17 : vector<8x2xf32>
    %19 = vector.extract_strided_slice %18 {offsets = [0, 0], sizes = [8, 1], strides = [1, 1]} : vector<8x2xf32> to vector<8x1xf32>
    %20 = vector.extract_strided_slice %18 {offsets = [0, 1], sizes = [8, 1], strides = [1, 1]} : vector<8x2xf32> to vector<8x1xf32>
    %21 = math.absf %20 : vector<8x1xf32>
    %cst_10 = arith.constant 0.000000e+00 : f32
    %22 = vector.broadcast %cst_10 : f32 to vector<8x1xf32>
    %23 = arith.subf %22, %21 : vector<8x1xf32>
    %24 = math.exp %23 : vector<8x1xf32>
    %25 = math.log1p %24 : vector<8x1xf32>
    %26 = arith.addf %21, %25 : vector<8x1xf32>
    %c0_11 = arith.constant 0 : index
    %c0_12 = arith.constant 0 : index
    %27 = vector.load %arg5[%c0_11, %c0_12] : memref<4x2xf32, #tpu.memory_space<vmem>>, vector<4x2xf32>
    %cst_13 = arith.constant dense<0.000000e+00> : vector<8x2xf32>
    %28 = tpu.matmul %13, %27, %cst_13 {dimension_numbers = #tpu.dot_dimension_numbers<[1], [0], [0], [1], [0, 0, 1, 1], [], []>} : vector<8x4xf32>, vector<4x2xf32>, vector<8x2xf32> -> vector<8x2xf32>
    %29 = vector.extract_strided_slice %28 {offsets = [0, 0], sizes = [8, 1], strides = [1, 1]} : vector<8x2xf32> to vector<8x1xf32>
    %30 = vector.extract_strided_slice %28 {offsets = [0, 1], sizes = [8, 1], strides = [1, 1]} : vector<8x2xf32> to vector<8x1xf32>
    %31 = arith.addf %19, %29 : vector<8x1xf32>
    %32 = arith.mulf %26, %26 : vector<8x1xf32>
    %33 = arith.mulf %30, %30 : vector<8x1xf32>
    %34 = arith.addf %32, %33 : vector<8x1xf32>
    %35 = math.sqrt %34 : vector<8x1xf32>
    %36 = tpu.concatenate %31, %35 in 1 : vector<8x1xf32>, vector<8x1xf32> -> vector<8x2xf32>
    %c0_14 = arith.constant 0 : index
    %c0_15 = arith.constant 0 : index
    %37 = vector.load %arg6[%c0_14, %c0_15] : memref<8x2xf32, #tpu.memory_space<vmem>>, vector<8x2xf32>
    tpu.vector_store %arg6[%c0_14, %c0_15], %36 {strides = array<i32>} : memref<8x2xf32, #tpu.memory_space<vmem>>, vector<8x2xf32>,
    return
  }
  func.func @transform_0(%arg0: i32) -> (i32, i32) {
    %c0_i32 = arith.constant 0 : i32
    %c0_i32_0 = arith.constant 0 : i32
    return %arg0, %c0_i32 : i32, i32
  }
  func.func @transform_1(%arg0: i32) -> (i32, i32) {
    %c0_i32 = arith.constant 0 : i32
    %c0_i32_0 = arith.constant 0 : i32
    %c0_i32_1 = arith.constant 0 : i32
    return %c0_i32, %c0_i32_0 : i32, i32
  }
  func.func @transform_2(%arg0: i32) -> (i32, i32) {
    %c0_i32 = arith.constant 0 : i32
    %c0_i32_0 = arith.constant 0 : i32
    %c0_i32_1 = arith.constant 0 : i32
    return %c0_i32, %c0_i32_0 : i32, i32
  }
  func.func @transform_3(%arg0: i32) -> (i32, i32) {
    %c0_i32 = arith.constant 0 : i32
    %c0_i32_0 = arith.constant 0 : i32
    %c0_i32_1 = arith.constant 0 : i32
    return %c0_i32, %c0_i32_0 : i32, i32
  }
  func.func @transform_4(%arg0: i32) -> (i32, i32) {
    %c0_i32 = arith.constant 0 : i32
    %c0_i32_0 = arith.constant 0 : i32
    %c0_i32_1 = arith.constant 0 : i32
    return %c0_i32, %c0_i32_0 : i32, i32
  }
  func.func @transform_5(%arg0: i32) -> (i32, i32) {
    %c0_i32 = arith.constant 0 : i32
    %c0_i32_0 = arith.constant 0 : i32
    return %arg0, %c0_i32 : i32, i32
  }
}

</mosaic_0001>

<bundles_post_ra>
// kernel: tpu_custom_call.1
= control target key start
LH: loop header
LB: loop body
LE: loop exit
PB: predicated region body
PF: predicated region fallthrough
CT: control target
= control target key end

     0   :  { %v350_v0 = vmov 0.0   ;;  %vm351_vm0 = vmmov 0   ;;  %vm30_vm1 = vcmask 130048   ;;  %vm209_vm2 = vcmask 1043456   ;;  %s352_s9 = smov 96   ;;  %s414_s1 = inlined_call_operand.vmem [shape: f32[16,36], index: 1, kind: input, shape index: {}]   ;;  %s415_s0 = inlined_call_operand.vmem [shape: f32[8,16], index: 0, kind: input, shape index: {}]   ;;  %s416_s2 = inlined_call_operand.vmem [shape: f32[32,2], index: 2, kind: input, shape index: {}]   ;;  %s417_s4 = inlined_call_operand.vmem [shape: f32[4,2], index: 4, kind: input, shape index: {}]   ;;  %s418_s3 = inlined_call_operand.vmem [shape: f32[1,38], index: 3, kind: input, shape index: {}]   ;;  %s419_s5 = inlined_call_operand.vmem [shape: f32[8,2], index: 5, kind: output, shape index: {}]  }
   0x1   :  { %317 = vmatprep.subr.mxu0 %v350_v0  ;;  %v23_v1 = vld [vmem:[%s414_s1 + $0x8] sm:$0xff]  ;;  %v22_v2 = vld [vmem:[%s414_s1] sm:$0xff]  ;;  %321 = vmatprep.mubr.msk.f32.mxu0 %vm351_vm0, %v350_v0  ;;  %v110_v4 = vld [vmem:[%s416_s2 + $0x18] sm:$0xff]  ;;  %vm114_vm4 = vcmask 261120   ;;  %vm206_vm5 = vcmask 31744   ;;  %vm294_vm8 = vcmask 7168  }
   0x2   :  { %318 = vmatpush3.msra.mxu0 %v23_v1  ;;  %v20_v3 = vld [vmem:[%s415_s0] sm:$0xff]  ;;  %324 = vmatprep.subr.mxu1 %v350_v0  ;;  %v109_v5 = vld [vmem:[%s416_s2 + $0x10] sm:$0xff]  ;;  %v108_v6 = vld [vmem:[%s416_s2 + $0x8] sm:$0xff]  ;;  %vm296_vm10 = vcmask 15360  }
   0x3   :  { %319 = vmatprep.subr.mxu0 %v350_v0  ;;  %325 = vmatpush3.msra.mxu1 %v110_v4  ;;  %v107_v7 = vld [vmem:[%s416_s2] sm:$0xff]  ;;  %s353_s2 = smov 92  }
   0x4   :  { %320 = vmatpush3.msra.mxu0 %v22_v2  ;;  %326 = vmatprep.subr.mxu1 %v350_v0  ;;  %v202_v8 = vld [vmem:[%s417_s4] sm:$0xf] }
   0x5   :  { %322 = vmatmul.mubr.msk.f32.vlgmr.msra.gmra.mxu0 %vm30_vm1, %v20_v3  ;;  %332 = vmatprep.mubr.msk.f32.mxu1 %vm351_vm0, %v350_v0  ;;  %v302_v9 = vld [vmem:[%s418_s3] ss:$0 sm:$0xff] }
   0x6   :  { %335 = vmatprep.subr.mxu0 %v350_v0  ;;  %337 = vmatprep.mubr.msk.f32.mxu0 %vm351_vm0, %v350_v0 }
   0x7   :  { %327 = vmatpush3.msra.mxu1 %v109_v5  ;;  %336 = vmatpush3.msk.msra.mxu0 %vm209_vm2, %v202_v8 }
   0x8   :  { %328 = vmatprep.subr.mxu1 %v350_v0 }
   0x9   :  { %329 = vmatpush3.msra.mxu1 %v108_v6 }
   0xa   :  { %330 = vmatprep.subr.mxu1 %v350_v0 }
   0xb   :  { %331 = vmatpush3.msra.mxu1 %v107_v7 }
  0xc5   :  { %v100_v10 = vpop.f32.mrf.mxu0 }
  0xc6   :  { %v101_v11 = vadd.f32 %v302_v9, %v100_v10 }
  0xc7   :  { %v323_v12 = vpop.f32.mrf.mxu0 }
  0xc8   :  { %204 = vrot.lane.b32.xlu0 %v101_v11, %s352_s9  ;;  %vm104_vm3 = vcmp.ge.f32.partialorder %v101_v11, 0.0  ;;  %v105_v13 = vmul.f32 0.01, %v101_v11 }
  0xca   :  { %v106_v14 = vsel %vm104_vm3, %v101_v11, %v105_v13 }
  0xcb   :  { %333 = vmatmul.mubr.msk.f32.vlgmr.msra.gmra.mxu1 %vm114_vm4, %v106_v14 }
  0xcc   :  { %111 = vrot.lane.b32.xlu0 %v302_v9, %s353_s2 }
 0x13a   :  { %v205_v15 = vpop.permute.xlu0 %204 }
 0x13b   :  { %338 = vmatmul.mubr.msk.f32.vlgmr.msra.gmra.mxu0 %vm206_vm5, %v205_v15 }
 0x13e   :  { %v112_v18 = vpop.permute.xlu0 %111 }
 0x18b   :  { %v184_v16 = vpop.f32.mrf.mxu1 }
 0x18c   :  { %v185_v19 = vadd.f32 %v184_v16, %v112_v18 }
 0x18d   :  { %v334_v17 = vpop.f32.mrf.mxu1 }
 0x18e   :  { %v188_v20 = vand.u32 2147483647, %v185_v19 }
 0x190   :  { %v189_v21 = vsub.f32 0.0, %v188_v20 }
 0x192   :  { %v190_v22 = vmul.f32 1.442695, %v189_v21 }
 0x194   :  { %344 = vpow2.f32 %v190_v22 }
 0x1a1   :  { %v345_v23 = vpop.eup %344 }
 0x1a2   :  { %v192_v24 = vadd.f32 1.0, %v345_v23  ;;  %v195_v25 = vmul.f32 -0.5, %v345_v23  ;;  %v198_v28 = vand.u32 2147483647, %v345_v23 }
 0x1a4   :  { %346 = vlog2.f32 %v192_v24  ;;  %v196_v27 = vadd.f32 1.0, %v195_v25  ;;  %vm199_vm6 = vcmp.lt.f32.partialorder %v198_v28, 0.0004427343 }
 0x1a6   :  { %v197_v30 = vmul.f32 %v345_v23, %v196_v27 }
 0x1b1   :  { %v347_v26 = vpop.eup %346 }
 0x1b2   :  { %v194_v29 = vmul.f32 0.6931472, %v347_v26 }
 0x1b4   :  { %v200_v31 = vsel %vm199_vm6, %v197_v30, %v194_v29 }
 0x1b5   :  { %v201_v32 = vadd.f32 %v200_v31, %v188_v20 }
 0x1b7   :  { %v284_v34 = vmul.f32 %v201_v32, %v201_v32 }
 0x1fb   :  { %v279_v33 = vpop.f32.mrf.mxu0 }
 0x1fc   :  { %v285_v35 = vmul.f32 %v279_v33, %v279_v33  ;;  %v283_v41 = vadd.f32 %v279_v33, %v185_v19 }
 0x1fd   :  { %v339_v36 = vpop.f32.mrf.mxu0 }
 0x1fe   :  { %v286_v37 = vadd.f32 %v285_v35, %v284_v34 }
 0x200   :  { %348 = vrsqrt.f32 %v286_v37  ;;  %vm289_vm7 = vcmp.eq.f32.partialorder %v286_v37, inf  ;;  %v292_v40 = vand.u32 2147483648, %v286_v37  ;;  %vm291_vm9 = vcmp.eq.f32.partialorder %v286_v37, 0.0 }
 0x20d   :  { %v349_v38 = vpop.eup %348 }
 0x20e   :  { %v288_v39 = vmul.f32 %v349_v38, %v286_v37 }
 0x210   :  { %v290_v42 = vsel %vm289_vm7, %v286_v37, %v288_v39 }
 0x211   :  { %v293_v43 = vsel %vm291_vm9, %v292_v40, %v290_v42 }
 0x212   :  { %v295_v44 = vsel %vm294_vm8, %v283_v41, %v293_v43 }
 0x213   :  { %297 = vst.msk [vmem:[%s419_s5] sm:$0xff] %vm296_vm10, %v295_v44 }

</bundles_post_ra>
